<compile_context>
chip_gen: v7x
topology: tpu7x:2x2x1
jax: 0.10.0
libtpu: 0.0.40
codegen_flags: <defaults>
</compile_context>

<pallas_src>
import jax
import jax.numpy as jnp
from jax.experimental import pallas as pl
from jax.experimental.pallas import tpu as pltpu


def _round_up(n: int, m: int) -> int:
    return ((n + m - 1) // m) * m


def _make_actor_kernel(max_action: float):
    def actor_kernel(x_ref, w1_ref, b1_ref, w2_ref, b2_ref, w3_ref, b3_ref, o_ref):
        # layer 1: bf16 MXU matmul, f32 accumulation; bias/ReLU on VPU in f32
        h1 = jnp.dot(x_ref[...], w1_ref[...],
                     preferred_element_type=jnp.float32) + b1_ref[...]
        h1 = jnp.maximum(h1, 0.0)
        # layer 2
        h2 = jnp.dot(h1.astype(jnp.bfloat16), w2_ref[...],
                     preferred_element_type=jnp.float32) + b2_ref[...]
        h2 = jnp.maximum(h2, 0.0)
        # layer 3 + tanh * max_action (tanh -> EUP, f32)
        h3 = jnp.dot(h2.astype(jnp.bfloat16), w3_ref[...],
                     preferred_element_type=jnp.float32) + b3_ref[...]
        o_ref[...] = (jnp.tanh(h3) * max_action).astype(o_ref.dtype)

    return actor_kernel


def actor_forward(x, params, max_action: float):
    """x: (B, state_dim) f32. params: f32 (in, out) weights / (1, out) biases.
    Returns (B, action_dim) f32."""
    B, state_dim = x.shape
    hidden1 = params["w1"].shape[1]     # 400
    hidden2 = params["w2"].shape[1]     # 300
    action_dim = params["w3"].shape[1]

    # Hardware-friendly padded feature sizes (128-lane aligned).
    S = _round_up(state_dim, 128)       # 16  -> 128
    H1 = _round_up(hidden1, 128)        # 400 -> 512
    H2 = _round_up(hidden2, 128)        # 300 -> 512
    A = _round_up(action_dim, 128)      # 4   -> 128

    # Batch tile: at least one sublane tile, capped so x/h1/h2/out stay small.
    TB = min(256, _round_up(B, 8))
    B_pad = _round_up(B, TB)

    def pad2(a, rows, cols, dtype):
        out = jnp.zeros((rows, cols), dtype)
        return out.at[: a.shape[0], : a.shape[1]].set(a.astype(dtype))

    xp = pad2(x, B_pad, S, jnp.bfloat16)
    w1 = pad2(params["w1"], S, H1, jnp.bfloat16)
    w2 = pad2(params["w2"], H1, H2, jnp.bfloat16)
    w3 = pad2(params["w3"], H2, A, jnp.bfloat16)
    b1 = pad2(params["b1"], 1, H1, jnp.float32)
    b2 = pad2(params["b2"], 1, H2, jnp.float32)
    b3 = pad2(params["b3"], 1, A, jnp.float32)

    grid = (B_pad // TB,)

    def resident(shape):
        # Weights/biases: same block every grid step -> stay VMEM-resident.
        return pl.BlockSpec(shape, lambda i: (0, 0))

    out_padded = pl.pallas_call(
        _make_actor_kernel(float(max_action)),
        out_shape=jax.ShapeDtypeStruct((B_pad, A), jnp.float32),
        grid=grid,
        in_specs=[
            pl.BlockSpec((TB, S), lambda i: (i, 0)),   # x: tiled over batch
            resident((S, H1)), resident((1, H1)),
            resident((H1, H2)), resident((1, H2)),
            resident((H2, A)), resident((1, A)),
        ],
        out_specs=pl.BlockSpec((TB, A), lambda i: (i, 0)),
        compiler_params=pltpu.CompilerParams(
            dimension_semantics=("parallel",),
        ),
    )(xp, w1, b1, w2, b2, w3, b3)

    return out_padded[:B, :action_dim]


def init_actor_params(key, state_dim, action_dim):
    """Mimics PyTorch nn.Linear default init (uniform +/- 1/sqrt(fan_in))."""
    def linear(k, fan_in, fan_out):
        kw, kb = jax.random.split(k)
        bound = 1.0 / jnp.sqrt(fan_in)
        w = jax.random.uniform(kw, (fan_in, fan_out), jnp.float32, -bound, bound)
        b = jax.random.uniform(kb, (1, fan_out), jnp.float32, -bound, bound)
        return w, b

    k1, k2, k3 = jax.random.split(key, 3)
    w1, b1 = linear(k1, state_dim, 400)
    w2, b2 = linear(k2, 400, 300)
    w3, b3 = linear(k3, 300, action_dim)
    return {"w1": w1, "b1": b1, "w2": w2, "b2": b2, "w3": w3, "b3": b3}


def actor_reference_f32(x, params, max_action):
    h1 = jnp.maximum(x @ params["w1"] + params["b1"], 0.0)
    h2 = jnp.maximum(h1 @ params["w2"] + params["b2"], 0.0)
    return jnp.tanh(h2 @ params["w3"] + params["b3"]) * max_action


def actor_reference_bf16(x, params, max_action):
    """Same bf16-operand / f32-accumulation quantization as the kernel."""
    bf16, f32 = jnp.bfloat16, jnp.float32
    h1 = jnp.dot(x.astype(bf16), params["w1"].astype(bf16),
                 preferred_element_type=f32) + params["b1"]
    h1 = jnp.maximum(h1, 0.0)
    h2 = jnp.dot(h1.astype(bf16), params["w2"].astype(bf16),
                 preferred_element_type=f32) + params["b2"]
    h2 = jnp.maximum(h2, 0.0)
    h3 = jnp.dot(h2.astype(bf16), params["w3"].astype(bf16),
                 preferred_element_type=f32) + params["b3"]
    return jnp.tanh(h3) * max_action


if __name__ == "__main__":
    key = jax.random.PRNGKey(0)
    k_params, k_x = jax.random.split(key)

    batch = 2
    state_dim = 16
    action_dim = 4
    max_action = 2.0

    params = init_actor_params(k_params, state_dim, action_dim)
    x = jax.random.normal(k_x, (batch, state_dim), jnp.float32)

    out = actor_forward(x, params, max_action)
    out = jax.block_until_ready(out)

    assert out.shape == (batch, action_dim), out.shape

    # Tight check vs. a reference with the same bf16 matmul quantization.
    ref_bf16 = actor_reference_bf16(x, params, max_action)
    assert jnp.allclose(out, ref_bf16, atol=1e-3, rtol=1e-3), \
        float(jnp.max(jnp.abs(out - ref_bf16)))

    # Loose check vs. full-f32 PyTorch-semantics reference (bf16 operand noise).
    ref_f32 = actor_reference_f32(x, params, max_action)
    assert jnp.allclose(out, ref_f32, atol=5e-2, rtol=5e-2), \
        float(jnp.max(jnp.abs(out - ref_f32)))

    print("KERNEL_OK")
</pallas_src>

<mosaic_0001>
module attributes {stable_mosaic.version = 11 : i64} {
  func.func @actor_kernel(%arg0: i32, %arg1: memref<8x128xbf16, #tpu.memory_space<vmem>>, %arg2: memref<128x512xbf16, #tpu.memory_space<vmem>>, %arg3: memref<1x512xf32, #tpu.memory_space<vmem>>, %arg4: memref<512x384xbf16, #tpu.memory_space<vmem>>, %arg5: memref<1x384xf32, #tpu.memory_space<vmem>>, %arg6: memref<384x128xbf16, #tpu.memory_space<vmem>>, %arg7: memref<1x128xf32, #tpu.memory_space<vmem>>, %arg8: memref<8x128xf32, #tpu.memory_space<vmem>>) attributes {dimension_semantics = [#tpu.dimension_semantics<parallel>], iteration_bounds = array<i64: 1>, scalar_prefetch = 0 : i64, scratch_operands = 0 : i64, tpu.core_type = #tpu.core_type<tc>, window_params = [{transform_indices = @transform_0, window_bounds = array<i64: 8, 128>}, {pipeline_mode = #tpu.pipeline_mode<synchronous>, transform_indices = @transform_1, window_bounds = array<i64: 128, 512>}, {pipeline_mode = #tpu.pipeline_mode<synchronous>, transform_indices = @transform_2, window_bounds = array<i64: 1, 512>}, {pipeline_mode = #tpu.pipeline_mode<synchronous>, transform_indices = @transform_3, window_bounds = array<i64: 512, 384>}, {pipeline_mode = #tpu.pipeline_mode<synchronous>, transform_indices = @transform_4, window_bounds = array<i64: 1, 384>}, {pipeline_mode = #tpu.pipeline_mode<synchronous>, transform_indices = @transform_5, window_bounds = array<i64: 384, 128>}, {pipeline_mode = #tpu.pipeline_mode<synchronous>, transform_indices = @transform_6, window_bounds = array<i64: 1, 128>}, {transform_indices = @transform_7, window_bounds = array<i64: 8, 128>}]} {
    %c0 = arith.constant 0 : index
    %c0_0 = arith.constant 0 : index
    %0 = vector.load %arg1[%c0, %c0_0] : memref<8x128xbf16, #tpu.memory_space<vmem>>, vector<8x128xbf16>
    %c0_1 = arith.constant 0 : index
    %c0_2 = arith.constant 0 : index
    %1 = vector.load %arg2[%c0_1, %c0_2] : memref<128x512xbf16, #tpu.memory_space<vmem>>, vector<128x512xbf16>
    %cst = arith.constant dense<0.000000e+00> : vector<8x512xf32>
    %2 = tpu.matmul %0, %1, %cst {dimension_numbers = #tpu.dot_dimension_numbers<[1], [0], [0], [1], [0, 0, 1, 1], [], []>} : vector<8x128xbf16>, vector<128x512xbf16>, vector<8x512xf32> -> vector<8x512xf32>
    %c0_3 = arith.constant 0 : index
    %c0_4 = arith.constant 0 : index
    %3 = vector.load %arg3[%c0_3, %c0_4] : memref<1x512xf32, #tpu.memory_space<vmem>>, vector<1x512xf32>
    %4 = vector.broadcast %3 : vector<1x512xf32> to vector<8x512xf32>
    %5 = arith.addf %2, %4 : vector<8x512xf32>
    %cst_5 = arith.constant 0.000000e+00 : f32
    %6 = vector.broadcast %cst_5 : f32 to vector<8x512xf32>
    %7 = arith.maximumf %5, %6 : vector<8x512xf32>
    %8 = arith.truncf %7 : vector<8x512xf32> to vector<8x512xbf16>
    %c0_6 = arith.constant 0 : index
    %c0_7 = arith.constant 0 : index
    %9 = vector.load %arg4[%c0_6, %c0_7] : memref<512x384xbf16, #tpu.memory_space<vmem>>, vector<512x384xbf16>
    %cst_8 = arith.constant dense<0.000000e+00> : vector<8x384xf32>
    %10 = tpu.matmul %8, %9, %cst_8 {dimension_numbers = #tpu.dot_dimension_numbers<[1], [0], [0], [1], [0, 0, 1, 1], [], []>} : vector<8x512xbf16>, vector<512x384xbf16>, vector<8x384xf32> -> vector<8x384xf32>
    %c0_9 = arith.constant 0 : index
    %c0_10 = arith.constant 0 : index
    %11 = vector.load %arg5[%c0_9, %c0_10] : memref<1x384xf32, #tpu.memory_space<vmem>>, vector<1x384xf32>
    %12 = vector.broadcast %11 : vector<1x384xf32> to vector<8x384xf32>
    %13 = arith.addf %10, %12 : vector<8x384xf32>
    %cst_11 = arith.constant 0.000000e+00 : f32
    %14 = vector.broadcast %cst_11 : f32 to vector<8x384xf32>
    %15 = arith.maximumf %13, %14 : vector<8x384xf32>
    %16 = arith.truncf %15 : vector<8x384xf32> to vector<8x384xbf16>
    %c0_12 = arith.constant 0 : index
    %c0_13 = arith.constant 0 : index
    %17 = vector.load %arg6[%c0_12, %c0_13] : memref<384x128xbf16, #tpu.memory_space<vmem>>, vector<384x128xbf16>
    %cst_14 = arith.constant dense<0.000000e+00> : vector<8x128xf32>
    %18 = tpu.matmul %16, %17, %cst_14 {dimension_numbers = #tpu.dot_dimension_numbers<[1], [0], [0], [1], [0, 0, 1, 1], [], []>} : vector<8x384xbf16>, vector<384x128xbf16>, vector<8x128xf32> -> vector<8x128xf32>
    %c0_15 = arith.constant 0 : index
    %c0_16 = arith.constant 0 : index
    %19 = vector.load %arg7[%c0_15, %c0_16] : memref<1x128xf32, #tpu.memory_space<vmem>>, vector<1x128xf32>
    %20 = vector.broadcast %19 : vector<1x128xf32> to vector<8x128xf32>
    %21 = arith.addf %18, %20 : vector<8x128xf32>
    %22 = math.tanh %21 : vector<8x128xf32>
    %cst_17 = arith.constant 2.000000e+00 : f32
    %23 = vector.broadcast %cst_17 : f32 to vector<8x128xf32>
    %24 = arith.mulf %22, %23 : vector<8x128xf32>
    %c0_18 = arith.constant 0 : index
    %c0_19 = arith.constant 0 : index
    %25 = vector.load %arg8[%c0_18, %c0_19] : memref<8x128xf32, #tpu.memory_space<vmem>>, vector<8x128xf32>
    tpu.vector_store %arg8[%c0_18, %c0_19], %24 {strides = array<i32>} : memref<8x128xf32, #tpu.memory_space<vmem>>, vector<8x128xf32>,
    return
  }
  func.func @transform_0(%arg0: i32) -> (i32, i32) {
    %c0_i32 = arith.constant 0 : i32
    %c0_i32_0 = arith.constant 0 : i32
    return %arg0, %c0_i32 : i32, i32
  }
  func.func @transform_1(%arg0: i32) -> (i32, i32) {
    %c0_i32 = arith.constant 0 : i32
    %c0_i32_0 = arith.constant 0 : i32
    %c0_i32_1 = arith.constant 0 : i32
    return %c0_i32, %c0_i32_0 : i32, i32
  }
  func.func @transform_2(%arg0: i32) -> (i32, i32) {
    %c0_i32 = arith.constant 0 : i32
    %c0_i32_0 = arith.constant 0 : i32
    %c0_i32_1 = arith.constant 0 : i32
    return %c0_i32, %c0_i32_0 : i32, i32
  }
  func.func @transform_3(%arg0: i32) -> (i32, i32) {
    %c0_i32 = arith.constant 0 : i32
    %c0_i32_0 = arith.constant 0 : i32
    %c0_i32_1 = arith.constant 0 : i32
    return %c0_i32, %c0_i32_0 : i32, i32
  }
  func.func @transform_4(%arg0: i32) -> (i32, i32) {
    %c0_i32 = arith.constant 0 : i32
    %c0_i32_0 = arith.constant 0 : i32
    %c0_i32_1 = arith.constant 0 : i32
    return %c0_i32, %c0_i32_0 : i32, i32
  }
  func.func @transform_5(%arg0: i32) -> (i32, i32) {
    %c0_i32 = arith.constant 0 : i32
    %c0_i32_0 = arith.constant 0 : i32
    %c0_i32_1 = arith.constant 0 : i32
    return %c0_i32, %c0_i32_0 : i32, i32
  }
  func.func @transform_6(%arg0: i32) -> (i32, i32) {
    %c0_i32 = arith.constant 0 : i32
    %c0_i32_0 = arith.constant 0 : i32
    %c0_i32_1 = arith.constant 0 : i32
    return %c0_i32, %c0_i32_0 : i32, i32
  }
  func.func @transform_7(%arg0: i32) -> (i32, i32) {
    %c0_i32 = arith.constant 0 : i32
    %c0_i32_0 = arith.constant 0 : i32
    return %arg0, %c0_i32 : i32, i32
  }
}

</mosaic_0001>

<bundles_post_ra>
// kernel: tpu_custom_call.1
= control target key start
LH: loop header
LB: loop body
LE: loop exit
PB: predicated region body
PF: predicated region fallthrough
CT: control target
= control target key end

     0   :  { %12 = vsyncpa [#allocation3], 0  ;;  %s2245_s0 = inlined_call_operand.hbm [shape: bf16[8,128], index: 0, kind: input, shape index: {}]   ;;  %s2246_s1 = inlined_call_operand.hbm [shape: bf16[128,512], index: 1, kind: input, shape index: {}]   ;;  %s2247_s2 = inlined_call_operand.vmem [shape: f32[1,512], index: 2, kind: input, shape index: {}]   ;;  %s2248_s3 = inlined_call_operand.hbm [shape: bf16[512,384], index: 3, kind: input, shape index: {}]   ;;  %s2249_s4 = inlined_call_operand.vmem [shape: f32[1,384], index: 4, kind: input, shape index: {}]   ;;  %s2250_s5 = inlined_call_operand.hbm [shape: bf16[384,128], index: 5, kind: input, shape index: {}]   ;;  %s2251_s6 = inlined_call_operand.vmem [shape: f32[1,128], index: 6, kind: input, shape index: {}]   ;;  %s2252_s7 = inlined_call_operand.hbm [shape: f32[8,128], index: 7, kind: output, shape index: {}]  }
   0x1   :  { %13 = vsyncpa [#allocation6], 0 }
   0x2   :  { %14 = vsyncpa [#allocation9], 0 }
   0x3   :  { %15 = vsyncpa [#allocation4], 0  ;;  %s2098_s24 = smov [#allocation5]   ;;  %s1980_s28 = scalar_lea.hbm %s2246_s1, 4096 }
   0x4   :  { %s31_s25 = sshll.u32 %s2098_s24, 4  ;;  %p1981_p0 = scmp.ne.s32.totalorder %s2246_s1, %s1980_s28  ;;  %s32_s25 = int_to_ptr.vmem [resolvable:$true] %s31_s25 }
   0x5   :  { %p1984_p1 = scmp.lt.u32.totalorder %s1980_s28, %s2246_s1 }
   0x7   :  { %p1986_p2 = pnand %p1984_p1, %p1981_p0 }
   0x9   :  { %1989 = shalt.err (!%p1986_p2)
}
   0xa   :  { %s1990_s10 = scalar_lea.vmem %s32_s25, 4096  ;;  %p1995_p4 = scmp.lt.s32.totalorder %s32_s25, %s32_s25 }
   0xb   :  { %p1991_p3 = scmp.ne.s32.totalorder %s32_s25, %s1990_s10  ;;  %p1996_p5 = scmp.lt.s32.totalorder %s1990_s10, %s1990_s10 }
   0xd   :  { %p1997_p6 = por %p1996_p5, %p1995_p4 }
   0xf   :  { %p1998_p7 = pnand %p1997_p6, %p1991_p3 }
  0x11   :  { %2001 = shalt.err (!%p1998_p7)
}
  0x12   :  { %s2099_s11 = smov 256   ;;  %s2100_s12 = smov 16  }
  0x13   :  { %37 = dma.hbm_to_vmem [thread:$0]  %s2246_s1, 4096, %s32_s25, [#allocation6], %s2099_s11, %s2099_s11, %s2100_s12  }
  0x14   :  { %s2101_s15 = smov [#allocation2]   ;;  %s2102_s17 = smov [#allocation7]  }
  0x15   :  { %s22_s16 = sshll.u32 %s2101_s15, 4  ;;  %s45_s18 = sshll.u32 %s2102_s17, 4  ;;  %s23_s16 = int_to_ptr.vmem [resolvable:$true] %s22_s16  ;;  %s46_s18 = int_to_ptr.vmem [resolvable:$true] %s45_s18 }
  0x16   :  { %s2002_s21 = scalar_lea.hbm %s2245_s0, 64 }
  0x17   :  { %p2003_p8 = scmp.ne.s32.totalorder %s2245_s0, %s2002_s21  ;;  %p2006_p9 = scmp.lt.u32.totalorder %s2002_s21, %s2245_s0 }
  0x19   :  { %p2008_p10 = pnand %p2006_p9, %p2003_p8 }
  0x1b   :  { %2011 = shalt.err (!%p2008_p10)
}
  0x1c   :  { %s2012_s1 = scalar_lea.vmem %s23_s16, 64  ;;  %p2017_p12 = scmp.lt.s32.totalorder %s23_s16, %s23_s16 }
  0x1d   :  { %p2013_p11 = scmp.ne.s32.totalorder %s23_s16, %s2012_s1  ;;  %p2018_p13 = scmp.lt.s32.totalorder %s2012_s1, %s2012_s1 }
  0x1f   :  { %p2019_p0 = por %p2018_p13, %p2017_p12 }
  0x21   :  { %p2020_p1 = pnand %p2019_p0, %p2013_p11 }
  0x23   :  { %2023 = shalt.err (!%p2020_p1)
}
  0x24   :  { %25 = dma.hbm_to_vmem [thread:$0]  %s2245_s0, 64, %s23_s16, [#allocation3]  }
  0x25   :  { %s2024_s30 = scalar_lea.hbm %s2248_s3, 12288 }
  0x26   :  { %p2025_p2 = scmp.ne.s32.totalorder %s2248_s3, %s2024_s30  ;;  %p2028_p3 = scmp.lt.u32.totalorder %s2024_s30, %s2248_s3 }
  0x28   :  { %p2030_p4 = pnand %p2028_p3, %p2025_p2 }
  0x2a   :  { %2033 = shalt.err (!%p2030_p4)
}
  0x2b   :  { %s2034_s12 = scalar_lea.vmem %s46_s18, 12288  ;;  %p2039_p6 = scmp.lt.s32.totalorder %s46_s18, %s46_s18 }
  0x2c   :  { %p2035_p5 = scmp.ne.s32.totalorder %s46_s18, %s2034_s12  ;;  %p2040_p7 = scmp.lt.s32.totalorder %s2034_s12, %s2034_s12 }
  0x2e   :  { %p2041_p8 = por %p2040_p7, %p2039_p6 }
  0x30   :  { %p2042_p9 = pnand %p2041_p8, %p2035_p5 }
  0x32   :  { %2045 = shalt.err (!%p2042_p9)
}
  0x33   :  { %s2103_s0 = smov 192   ;;  %s2104_s13 = smov 12  }
  0x34   :  { %51 = dma.hbm_to_vmem [thread:$0]  %s2248_s3, 12288, %s46_s18, [#allocation6], %s2103_s0, %s2103_s0, %s2104_s13  }
  0x35   :  { %s2105_s16 = smov [#allocation8]   ;;  %s2046_s21 = scalar_lea.hbm %s2250_s5, 3072 }
  0x36   :  { %s59_s17 = sshll.u32 %s2105_s16, 4  ;;  %p2047_p10 = scmp.ne.s32.totalorder %s2250_s5, %s2046_s21  ;;  %s60_s17 = int_to_ptr.vmem [resolvable:$true] %s59_s17 }
  0x37   :  { %p2050_p11 = scmp.lt.u32.totalorder %s2046_s21, %s2250_s5 }
  0x39   :  { %p2052_p12 = pnand %p2050_p11, %p2047_p10 }
  0x3b   :  { %2055 = shalt.err (!%p2052_p12)
}
  0x3c   :  { %s2056_s1 = scalar_lea.vmem %s60_s17, 3072  ;;  %p2061_p0 = scmp.lt.s32.totalorder %s60_s17, %s60_s17 }
  0x3d   :  { %p2057_p13 = scmp.ne.s32.totalorder %s60_s17, %s2056_s1  ;;  %p2062_p1 = scmp.lt.s32.totalorder %s2056_s1, %s2056_s1 }
  0x3f   :  { %p2063_p2 = por %p2062_p1, %p2061_p0 }
  0x41   :  { %p2064_p3 = pnand %p2063_p2, %p2057_p13 }
  0x43   :  { %2067 = shalt.err (!%p2064_p3)
}
  0x44   :  { %s2106_s3 = smov 64   ;;  %s2107_s18 = smov 4  }
  0x45   :  { %65 = dma.hbm_to_vmem [thread:$0]  %s2250_s5, 3072, %s60_s17, [#allocation9], %s2106_s3, %s2106_s3, %s2107_s18  }
  0x46   :  { %2090 = dma.done.wait [#allocation3], 64  }
  0x47   :  { %2091 = vsyncadd [#allocation3], 4294967232 }
  0x48   :  { %2092 = dma.done.wait [#allocation6], 16384  }
  0x49   :  { %2093 = vsyncadd [#allocation6], 4294950912 }
  0x4a   :  { %2094 = dma.done.wait [#allocation9], 3072  }
  0x4b   :  { %2095 = vsyncadd [#allocation9], 4294964224  ;;  %v2108_v0 = vmov 0   ;;  %v1778_v1 = vld [vmem:[#allocation5 + $0x4] ss:$16 sps:$4 sm:$0xff]   ;;  %vm2110_vm0 = vmmov 0  }
  0x4c   :  { %328 = vmatprep.mubr.bf16.mxu0 %v2108_v0  ;;  %369 = vmatprep.mubr.bf16.mxu1 %v2108_v0  ;;  %v1780_v2 = vld [vmem:[#allocation5] ss:$16 sps:$4 sm:$0xff]   ;;  %v1781_v3 = vld [vmem:[#allocation5 + $0x24] ss:$16 sps:$4 sm:$0xff]   ;;  %v1802_v10 = vld [vmem:[#allocation5 + $0xc] ss:$16 sps:$4 sm:$0xff]  }
  0x4d   :  { %296 = vmatprep.subr.bf16.mxu0 %v1778_v1  ;;  %v1783_v4 = vld [vmem:[#allocation5 + $0x20] ss:$16 sps:$4 sm:$0xff]   ;;  %v1784_v5 = vld [vmem:[#allocation5 + $0x44] ss:$16 sps:$4 sm:$0xff]   ;;  %v1804_v11 = vld [vmem:[#allocation5 + $0x8] ss:$16 sps:$4 sm:$0xff]   ;;  %337 = vmatprep.subr.bf16.mxu1 %v1802_v10 }
  0x4e   :  { %297 = vmatpush1.bf16.msra.mxu0 %v1780_v2  ;;  %v1786_v6 = vld [vmem:[#allocation5 + $0x40] ss:$16 sps:$4 sm:$0xff]   ;;  %v1787_v7 = vld [vmem:[#allocation5 + $0x64] ss:$16 sps:$4 sm:$0xff]   ;;  %v1805_v12 = vld [vmem:[#allocation5 + $0x2c] ss:$16 sps:$4 sm:$0xff]   ;;  %338 = vmatpush1.bf16.msra.mxu1 %v1804_v11 }
  0x4f   :  { %298 = vmatprep.subr.bf16.mxu0 %v1781_v3  ;;  %v1789_v8 = vld [vmem:[#allocation5 + $0x60] ss:$16 sps:$4 sm:$0xff]   ;;  %v1790_v9 = vld [vmem:[#allocation5 + $0x84] ss:$16 sps:$4 sm:$0xff]   ;;  %v1807_v14 = vld [vmem:[#allocation5 + $0x28] ss:$16 sps:$4 sm:$0xff]   ;;  %339 = vmatprep.subr.bf16.mxu1 %v1805_v12 }
  0x50   :  { %v1792_v13 = vld [vmem:[#allocation5 + $0x80] ss:$16 sps:$4 sm:$0xff]   ;;  %v1808_v15 = vld [vmem:[#allocation5 + $0x4c] ss:$16 sps:$4 sm:$0xff]   ;;  %v1793_v16 = vld [vmem:[#allocation5 + $0xa4] ss:$16 sps:$4 sm:$0xff]  }
  0x51   :  { %v1795_v17 = vld [vmem:[#allocation5 + $0xa0] ss:$16 sps:$4 sm:$0xff]   ;;  %v1810_v18 = vld [vmem:[#allocation5 + $0x48] ss:$16 sps:$4 sm:$0xff]   ;;  %v1811_v19 = vld [vmem:[#allocation5 + $0x6c] ss:$16 sps:$4 sm:$0xff]  }
  0x52   :  { %299 = vmatpush1.bf16.msra.mxu0 %v1783_v4  ;;  %340 = vmatpush1.bf16.msra.mxu1 %v1807_v14  ;;  %v1796_v20 = vld [vmem:[#allocation5 + $0xc4] ss:$16 sps:$4 sm:$0xff]   ;;  %v1798_v21 = vld [vmem:[#allocation5 + $0xc0] ss:$16 sps:$4 sm:$0xff]   ;;  %v1813_v22 = vld [vmem:[#allocation5 + $0x68] ss:$16 sps:$4 sm:$0xff]  }
  0x53   :  { %300 = vmatprep.subr.bf16.mxu0 %v1784_v5  ;;  %341 = vmatprep.subr.bf16.mxu1 %v1808_v15  ;;  %v1814_v23 = vld [vmem:[#allocation5 + $0x8c] ss:$16 sps:$4 sm:$0xff]   ;;  %v1799_v24 = vld [vmem:[#allocation5 + $0xe4] ss:$16 sps:$4 sm:$0xff]   ;;  %v1801_v25 = vld [vmem:[#allocation5 + $0xe0] ss:$16 sps:$4 sm:$0xff]  }
  0x54   :  { %v1816_v26 = vld [vmem:[#allocation5 + $0x88] ss:$16 sps:$4 sm:$0xff]   ;;  %v1817_v27 = vld [vmem:[#allocation5 + $0xac] ss:$16 sps:$4 sm:$0xff]   ;;  %v1828_v28 = vld [vmem:[#allocation7 + $0x4] ss:$12 sps:$4 sm:$0xff]  }
  0x55   :  { %v81_v29 = vld [vmem:[#allocation2] sm:$0xf]  ;;  %v1819_v30 = vld [vmem:[#allocation5 + $0xa8] ss:$16 sps:$4 sm:$0xff]   ;;  %v1826_v32 = vld [vmem:[#allocation7] ss:$12 sps:$4 sm:$0xff]  }
  0x56   :  { %301 = vmatpush1.bf16.msra.mxu0 %v1786_v6  ;;  %342 = vmatpush1.bf16.msra.mxu1 %v1810_v18  ;;  %v1820_v31 = vld [vmem:[#allocation5 + $0xcc] ss:$16 sps:$4 sm:$0xff]   ;;  %v1822_v34 = vld [vmem:[#allocation5 + $0xc8] ss:$16 sps:$4 sm:$0xff]   ;;  %v1834_v37 = vld [vmem:[#allocation7 + $0x34] ss:$12 sps:$4 sm:$0xff]  }
  0x57   :  { %302 = vmatprep.subr.bf16.mxu0 %v1787_v7  ;;  %343 = vmatprep.subr.bf16.mxu1 %v1811_v19  ;;  %v1831_v33 = vld [vmem:[#allocation7 + $0x1c] ss:$12 sps:$4 sm:$0xff]   ;;  %v1829_v36 = vld [vmem:[#allocation7 + $0x18] ss:$12 sps:$4 sm:$0xff]   ;;  %v1858_v44 = vld [vmem:[#allocation7 + $0xe0] ss:$12 sps:$4 sm:$0xff]  }
  0x58   :  { %v1823_v35 = vld [vmem:[#allocation5 + $0xec] ss:$16 sps:$4 sm:$0xff]   ;;  %v1825_v38 = vld [vmem:[#allocation5 + $0xe8] ss:$16 sps:$4 sm:$0xff]   ;;  %v1840_v45 = vld [vmem:[#allocation7 + $0x64] ss:$12 sps:$4 sm:$0xff]  }
  0x59   :  { %v1832_v39 = vld [vmem:[#allocation7 + $0x30] ss:$12 sps:$4 sm:$0xff]   ;;  %v1853_v40 = vld [vmem:[#allocation7 + $0xc8] ss:$12 sps:$4 sm:$0xff]   ;;  %v1837_v41 = vld [vmem:[#allocation7 + $0x4c] ss:$12 sps:$4 sm:$0xff]  }
  0x5a   :  { %303 = vmatpush1.bf16.msra.mxu0 %v1789_v8  ;;  %344 = vmatpush1.bf16.msra.mxu1 %v1813_v22  ;;  %v1854_v42 = vld [vmem:[#allocation7 + $0x8] ss:$12 sps:$4 sm:$0xff]   ;;  %v1838_v46 = vld [vmem:[#allocation7 + $0x60] ss:$12 sps:$4 sm:$0xff]   ;;  %v1863_v48 = vld [vmem:[#allocation7 + $0xf8] ss:$12 sps:$4 sm:$0xff]  }
  0x5b   :  { %304 = vmatprep.subr.bf16.mxu0 %v1790_v9  ;;  %345 = vmatprep.subr.bf16.mxu1 %v1814_v23  ;;  %v1835_v43 = vld [vmem:[#allocation7 + $0x48] ss:$12 sps:$4 sm:$0xff]   ;;  %v1859_v47 = vld [vmem:[#allocation7 + $0x20] ss:$12 sps:$4 sm:$0xff]   ;;  %v1841_v50 = vld [vmem:[#allocation7 + $0x78] ss:$12 sps:$4 sm:$0xff]  }
  0x5c   :  { %v1843_v49 = vld [vmem:[#allocation7 + $0x7c] ss:$12 sps:$4 sm:$0xff]   ;;  %v1864_v51 = vld [vmem:[#allocation7 + $0x38] ss:$12 sps:$4 sm:$0xff]   ;;  %v1846_v53 = vld [vmem:[#allocation7 + $0x94] ss:$12 sps:$4 sm:$0xff]  }
  0x5d   :  { %v1868_v52 = vld [vmem:[#allocation7 + $0x110] ss:$12 sps:$4 sm:$0xff]   ;;  %v1873_v56 = vld [vmem:[#allocation7 + $0x128] ss:$12 sps:$4 sm:$0xff]   ;;  %v1849_v57 = vld [vmem:[#allocation7 + $0xac] ss:$12 sps:$4 sm:$0xff]  }
  0x5e   :  { %305 = vmatpush1.bf16.msra.mxu0 %v1792_v13  ;;  %346 = vmatpush1.bf16.msra.mxu1 %v1816_v26  ;;  %v1869_v54 = vld [vmem:[#allocation7 + $0x50] ss:$12 sps:$4 sm:$0xff]   ;;  %v1874_v58 = vld [vmem:[#allocation7 + $0x68] ss:$12 sps:$4 sm:$0xff]   ;;  %v1878_v60 = vld [vmem:[#allocation7 + $0x140] ss:$12 sps:$4 sm:$0xff]  }
  0x5f   :  { %306 = vmatprep.subr.bf16.mxu0 %v1793_v16  ;;  %347 = vmatprep.subr.bf16.mxu1 %v1817_v27  ;;  %v1844_v55 = vld [vmem:[#allocation7 + $0x90] ss:$12 sps:$4 sm:$0xff]   ;;  %v1847_v59 = vld [vmem:[#allocation7 + $0xa8] ss:$12 sps:$4 sm:$0xff]   ;;  %v1879_v62 = vld [vmem:[#allocation7 + $0x80] ss:$12 sps:$4 sm:$0xff]  }
  0x60   :  { %v1852_v61 = vld [vmem:[#allocation7 + $0xc4] ss:$12 sps:$4 sm:$0xff]   ;;  %v1850_v63 = vld [vmem:[#allocation7 + $0xc0] ss:$12 sps:$4 sm:$0xff]   ;;  %v1857_v0 = vld [vmem:[#allocation7 + $0xdc] ss:$12 sps:$4 sm:$0xff]  }
  0x61   :  { %v1855_v1 = vld [vmem:[#allocation7 + $0xd8] ss:$12 sps:$4 sm:$0xff]   ;;  %v1862_v2 = vld [vmem:[#allocation7 + $0xf4] ss:$12 sps:$4 sm:$0xff]   ;;  %v1860_v3 = vld [vmem:[#allocation7 + $0xf0] ss:$12 sps:$4 sm:$0xff]  }
  0x62   :  { %307 = vmatpush1.bf16.msra.mxu0 %v1795_v17  ;;  %348 = vmatpush1.bf16.msra.mxu1 %v1819_v30  ;;  %v1867_v4 = vld [vmem:[#allocation7 + $0x10c] ss:$12 sps:$4 sm:$0xff]   ;;  %v1865_v5 = vld [vmem:[#allocation7 + $0x108] ss:$12 sps:$4 sm:$0xff]   ;;  %v1872_v6 = vld [vmem:[#allocation7 + $0x124] ss:$12 sps:$4 sm:$0xff]  }
  0x63   :  { %308 = vmatprep.subr.bf16.mxu0 %v1796_v20  ;;  %349 = vmatprep.subr.bf16.mxu1 %v1820_v31  ;;  %v1870_v7 = vld [vmem:[#allocation7 + $0x120] ss:$12 sps:$4 sm:$0xff]   ;;  %v1877_v8 = vld [vmem:[#allocation7 + $0x13c] ss:$12 sps:$4 sm:$0xff]   ;;  %v1875_v9 = vld [vmem:[#allocation7 + $0x138] ss:$12 sps:$4 sm:$0xff]   ;;  %v116_v20 = vlaneseq }
  0x64   :  { %v1882_v10 = vld [vmem:[#allocation7 + $0x154] ss:$12 sps:$4 sm:$0xff]   ;;  %v1883_v11 = vld [vmem:[#allocation7 + $0x158] ss:$12 sps:$4 sm:$0xff]   ;;  %v1880_v12 = vld [vmem:[#allocation7 + $0x150] ss:$12 sps:$4 sm:$0xff]  }
  0x65   :  { %v1884_v13 = vld [vmem:[#allocation7 + $0x98] ss:$12 sps:$4 sm:$0xff]   ;;  %v1888_v15 = vld [vmem:[#allocation7 + $0x170] ss:$12 sps:$4 sm:$0xff]   ;;  %v1885_v16 = vld [vmem:[#allocation7 + $0x168] ss:$12 sps:$4 sm:$0xff]  }
  0x66   :  { %309 = vmatpush1.bf16.msra.mxu0 %v1798_v21  ;;  %350 = vmatpush1.bf16.msra.mxu1 %v1822_v34  ;;  %v1887_v14 = vld [vmem:[#allocation7 + $0x16c] ss:$12 sps:$4 sm:$0xff]   ;;  %v1889_v17 = vld [vmem:[#allocation7 + $0xb0] ss:$12 sps:$4 sm:$0xff]   ;;  %v1893_v19 = vld [vmem:[#allocation7 + $0x248] ss:$12 sps:$4 sm:$0xff]  }
  0x67   :  { %310 = vmatprep.subr.bf16.mxu0 %v1799_v24  ;;  %351 = vmatprep.subr.bf16.mxu1 %v1823_v35  ;;  %v1892_v18 = vld [vmem:[#allocation7 + $0x184] ss:$12 sps:$4 sm:$0xff]   ;;  %v2200_v21 = vshrl.u32 %v116_v20, 7  ;;  %v2206_v23 = vld [vmem:[%s2247_s2] sm:$0xf]  ;;  %s2111_s8 = smov [#allocation10]  }
  0x68   :  { %v1933_v20 = vld [vmem:[#allocation7 + $0x258] ss:$12 sps:$4 sm:$0xff]   ;;  %s1499_s9 = sshll.u32 %s2111_s8, 4  ;;  %s1500_s9 = int_to_ptr.vmem [resolvable:$true] %s1499_s9 }
  0x69   :  { %v118_v22 = vsub.s32 0, %v2200_v21  ;;  %v122_v24 = vsub.s32 1, %v2200_v21  ;;  %v130_v35 = vsub.s32 3, %v2200_v21  ;;  %s2068_s10 = scalar_lea.vmem %s1500_s9, 128  ;;  %p2073_p5 = scmp.lt.s32.totalorder %s1500_s9, %s1500_s9 }
  0x6a   :  { %311 = vmatpush1.bf16.msra.mxu0 %v1801_v25  ;;  %352 = vmatpush1.bf16.msra.mxu1 %v1825_v38  ;;  %v1894_v38 = vld [vmem:[#allocation7 + $0x188] ss:$12 sps:$4 sm:$0xff]   ;;  %p2069_p4 = scmp.ne.s32.totalorder %s1500_s9, %s2068_s10  ;;  %p2074_p6 = scmp.lt.s32.totalorder %s2068_s10, %s2068_s10 }
  0x6b   :  { %1043 = vmatprep.subr.bf16.mxu0 %v1828_v28  ;;  %1663 = vmatprep.subr.bf16.mxu1 %v1853_v40  ;;  %v119_v25 = vrot.slane %v2206_v23, %v118_v22  ;;  %v123_v26 = vrot.slane %v2206_v23, %v122_v24  ;;  %v1897_v40 = vld [vmem:[#allocation7 + $0x19c] ss:$12 sps:$4 sm:$0xff]  }
  0x6c   :  { %p2075_p7 = por %p2074_p6, %p2073_p5 }
  0x6d   :  { %329 = vmatmul.mubr.bf16.vlgmr.msra.gmra.mrb[0].mxu0 %v81_v29  ;;  %370 = vmatmul.mubr.bf16.vlgmr.msra.gmra.mrb[0].mxu1 %v81_v29 }
  0x6e   :  { %1044 = vmatpush1.bf16.msra.mxu0 %v1826_v32  ;;  %1664 = vmatpush3.bf16.msra.mxu1 %v1854_v42  ;;  %v131_v42 = vrot.slane %v2206_v23, %v130_v35  ;;  %v1951_v35 = vld [vmem:[#allocation7 + $0x2e8] ss:$12 sps:$4 sm:$0xff]   ;;  %p2076_p8 = pnand %p2075_p7, %p2069_p4 }
  0x6f   :  { %1045 = vmatprep.subr.bf16.mxu0 %v1831_v33  ;;  %1665 = vmatprep.subr.bf16.mxu1 %v1858_v44  ;;  %v1899_v44 = vld [vmem:[#allocation7 + $0x1a0] ss:$12 sps:$4 sm:$0xff]  }
  0x72   :  { %1046 = vmatpush1.bf16.msra.mxu0 %v1829_v36  ;;  %1666 = vmatpush3.bf16.msra.mxu1 %v1859_v47 }
  0x73   :  { %1047 = vmatprep.subr.bf16.mxu0 %v1834_v37  ;;  %1667 = vmatprep.subr.bf16.mxu1 %v1863_v48  ;;  %v1890_v37 = vld [vmem:[#allocation7 + $0x180] ss:$12 sps:$4 sm:$0xff]  }
  0x76   :  { %1048 = vmatpush1.bf16.msra.mxu0 %v1832_v39  ;;  %1668 = vmatpush3.bf16.msra.mxu1 %v1864_v51  ;;  %v1900_v51 = vld [vmem:[#allocation7 + $0x1b0] ss:$12 sps:$4 sm:$0xff]  }
  0x77   :  { %1049 = vmatprep.subr.bf16.mxu0 %v1837_v41  ;;  %1669 = vmatprep.subr.bf16.mxu1 %v1868_v52  ;;  %v1898_v41 = vld [vmem:[#allocation7 + $0x260] ss:$12 sps:$4 sm:$0xff]   ;;  %v1904_v52 = vld [vmem:[#allocation7 + $0x1b8] ss:$12 sps:$4 sm:$0xff]  }
  0x7a   :  { %1050 = vmatpush1.bf16.msra.mxu0 %v1835_v43  ;;  %1670 = vmatpush3.bf16.msra.mxu1 %v1869_v54  ;;  %v1895_v43 = vld [vmem:[#allocation7 + $0x198] ss:$12 sps:$4 sm:$0xff]  }
  0x7b   :  { %1051 = vmatprep.subr.bf16.mxu0 %v1840_v45  ;;  %1671 = vmatprep.subr.bf16.mxu1 %v1873_v56  ;;  %v1902_v45 = vld [vmem:[#allocation7 + $0x1b4] ss:$12 sps:$4 sm:$0xff]   ;;  %v1907_v54 = vld [vmem:[#allocation7 + $0x1cc] ss:$12 sps:$4 sm:$0xff]  }
  0x7e   :  { %1052 = vmatpush1.bf16.msra.mxu0 %v1838_v46  ;;  %1672 = vmatpush3.bf16.msra.mxu1 %v1874_v58  ;;  %v1903_v46 = vld [vmem:[#allocation7 + $0x278] ss:$12 sps:$4 sm:$0xff]   ;;  %v1905_v58 = vld [vmem:[#allocation7 + $0x1c8] ss:$12 sps:$4 sm:$0xff]  }
  0x7f   :  { %1053 = vmatprep.subr.bf16.mxu0 %v1843_v49  ;;  %1673 = vmatprep.subr.bf16.mxu1 %v1878_v60  ;;  %v1912_v60 = vld [vmem:[#allocation7 + $0x1e4] ss:$12 sps:$4 sm:$0xff]  }
  0x82   :  { %1054 = vmatpush1.bf16.msra.mxu0 %v1841_v50  ;;  %1674 = vmatpush3.bf16.msra.mxu1 %v1879_v62  ;;  %v126_v62 = vsub.s32 2, %v2200_v21  ;;  %v1972_v21 = vld [vmem:[#allocation8 + $0x90] sm:$0xff]  }
  0x83   :  { %1055 = vmatprep.subr.bf16.mxu0 %v1846_v53  ;;  %1675 = vmatprep.subr.bf16.mxu1 %v1883_v11  ;;  %v1927_v11 = vld [vmem:[#allocation7 + $0x22c] ss:$12 sps:$4 sm:$0xff]  }
  0x86   :  { %1056 = vmatpush1.bf16.msra.mxu0 %v1844_v55  ;;  %1676 = vmatpush3.bf16.msra.mxu1 %v1884_v13  ;;  %v1908_v55 = vld [vmem:[#allocation7 + $0x290] ss:$12 sps:$4 sm:$0xff]  }
  0x87   :  { %1057 = vmatprep.subr.bf16.mxu0 %v1849_v57  ;;  %1677 = vmatprep.subr.bf16.mxu1 %v1888_v15  ;;  %v1929_v15 = vld [vmem:[#allocation7 + $0x230] ss:$12 sps:$4 sm:$0xff]  }
  0x8a   :  { %1058 = vmatpush1.bf16.msra.mxu0 %v1847_v59  ;;  %1678 = vmatpush3.bf16.msra.mxu1 %v1889_v17  ;;  %v1909_v59 = vld [vmem:[#allocation7 + $0x1d0] ss:$12 sps:$4 sm:$0xff]  }
  0x8b   :  { %1059 = vmatprep.subr.bf16.mxu0 %v1852_v61  ;;  %1685 = vmatprep.subr.bf16.mxu1 %v1893_v19  ;;  %v1913_v61 = vld [vmem:[#allocation7 + $0x2a8] ss:$12 sps:$4 sm:$0xff]  }
  0x8c   :  { %v1935_v19 = vld [vmem:[#allocation7 + $0x25c] ss:$12 sps:$4 sm:$0xff]  }
  0x8e   :  { %1060 = vmatpush1.bf16.msra.mxu0 %v1850_v63  ;;  %v1910_v63 = vld [vmem:[#allocation7 + $0x1e0] ss:$12 sps:$4 sm:$0xff]  }
  0x8f   :  { %1061 = vmatprep.subr.bf16.mxu0 %v1857_v0  ;;  %v1914_v0 = vld [vmem:[#allocation7 + $0x1e8] ss:$12 sps:$4 sm:$0xff]  }
  0x92   :  { %1062 = vmatpush1.bf16.msra.mxu0 %v1855_v1  ;;  %v1917_v1 = vld [vmem:[#allocation7 + $0x1fc] ss:$12 sps:$4 sm:$0xff]  }
  0x93   :  { %1063 = vmatprep.subr.bf16.mxu0 %v1862_v2  ;;  %v1918_v2 = vld [vmem:[#allocation7 + $0x2c0] ss:$12 sps:$4 sm:$0xff]  }
  0x96   :  { %1064 = vmatpush1.bf16.msra.mxu0 %v1860_v3  ;;  %v127_v3 = vrot.slane %v2206_v23, %v126_v62  ;;  %v1938_v23 = vld [vmem:[#allocation7 + $0x274] ss:$12 sps:$4 sm:$0xff]  }
  0x97   :  { %1065 = vmatprep.subr.bf16.mxu0 %v1867_v4  ;;  %v1915_v4 = vld [vmem:[#allocation7 + $0x1f8] ss:$12 sps:$4 sm:$0xff]  }
  0x9a   :  { %1066 = vmatpush1.bf16.msra.mxu0 %v1865_v5  ;;  %v1919_v5 = vld [vmem:[#allocation7 + $0x200] ss:$12 sps:$4 sm:$0xff]  }
  0x9b   :  { %1067 = vmatprep.subr.bf16.mxu0 %v1872_v6  ;;  %v1922_v6 = vld [vmem:[#allocation7 + $0x214] ss:$12 sps:$4 sm:$0xff]  }
  0x9e   :  { %1068 = vmatpush1.bf16.msra.mxu0 %v1870_v7  ;;  %v1923_v7 = vld [vmem:[#allocation7 + $0x2d8] ss:$12 sps:$4 sm:$0xff]  }
  0x9f   :  { %1069 = vmatprep.subr.bf16.mxu0 %v1877_v8 }
  0xa2   :  { %1070 = vmatpush1.bf16.msra.mxu0 %v1875_v9  ;;  %v1920_v9 = vld [vmem:[#allocation7 + $0x210] ss:$12 sps:$4 sm:$0xff]  }
  0xa3   :  { %1071 = vmatprep.subr.bf16.mxu0 %v1882_v10  ;;  %v1924_v10 = vld [vmem:[#allocation7 + $0x218] ss:$12 sps:$4 sm:$0xff]  }
  0xa6   :  { %1072 = vmatpush1.bf16.msra.mxu0 %v1880_v12  ;;  %v1928_v12 = vld [vmem:[#allocation7 + $0x2f0] ss:$12 sps:$4 sm:$0xff]  }
  0xa7   :  { %1073 = vmatprep.subr.bf16.mxu0 %v1887_v14  ;;  %v1925_v14 = vld [vmem:[#allocation7 + $0x228] ss:$12 sps:$4 sm:$0xff]  }
  0xaa   :  { %1074 = vmatpush1.bf16.msra.mxu0 %v1885_v16  ;;  %v1932_v16 = vld [vmem:[#allocation7 + $0x244] ss:$12 sps:$4 sm:$0xff]  }
  0xab   :  { %1084 = vmatprep.subr.bf16.mxu0 %v1892_v18  ;;  %v1930_v18 = vld [vmem:[#allocation7 + $0x240] ss:$12 sps:$4 sm:$0xff]  }
 0x140   :  { %v330_v27 = vpop.f32.mrb[0].mxu0  ;;  %v371_v47 = vpop.f32.mrb[0].mxu1 }
 0x141   :  { %v331_v28 = vadd.f32 %v330_v27, %v119_v25  ;;  %v332_v29 = vpop.f32.mrb[1].mxu0  ;;  %v373_v48 = vpop.f32.mrb[1].mxu1  ;;  %v372_v8 = vadd.f32 %v371_v47, %v127_v3  ;;  %v1936_v25 = vld [vmem:[#allocation7 + $0x270] ss:$12 sps:$4 sm:$0xff]   ;;  %v1939_v27 = vld [vmem:[#allocation7 + $0x288] ss:$12 sps:$4 sm:$0xff]  }
 0x142   :  { %v333_v30 = vadd.f32 %v332_v29, %v123_v26  ;;  %v334_v31 = vpop.f32.mrb[2].mxu0  ;;  %v374_v49 = vadd.f32 %v373_v48, %v131_v42  ;;  %v375_v50 = vpop.f32.mrb[2].mxu1  ;;  %v1941_v26 = vld [vmem:[#allocation7 + $0x28c] ss:$12 sps:$4 sm:$0xff]   ;;  %v1966_v48 = vld [vmem:[#allocation8 + $0x70] sm:$0xff]  }
 0x143   :  { %v378_v32 = vmax.f32 %v331_v28, 0.0  ;;  %v335_v33 = vpop.f32.mrb[3].mxu0  ;;  %v376_v53 = vpop.f32.mrb[3].mxu1  ;;  %v380_v13 = vmax.f32 %v372_v8, 0.0  ;;  %v1944_v28 = vld [vmem:[#allocation7 + $0x2a4] ss:$12 sps:$4 sm:$0xff]  }
 0x144   :  { %v379_v34 = vmax.f32 %v333_v30, 0.0  ;;  %v381_v56 = vmax.f32 %v374_v49, 0.0  ;;  %v1942_v29 = vld [vmem:[#allocation7 + $0x2a0] ss:$12 sps:$4 sm:$0xff]   ;;  %v1947_v30 = vld [vmem:[#allocation7 + $0x2bc] ss:$12 sps:$4 sm:$0xff]  }
 0x145   :  { %v382_v39 = vpack.c.bf16 %v378_v32, %v378_v32  ;;  %v384_v17 = vpack.c.bf16 %v380_v13, %v380_v13  ;;  %v1945_v31 = vld [vmem:[#allocation7 + $0x2b8] ss:$12 sps:$4 sm:$0xff]   ;;  %v1950_v32 = vld [vmem:[#allocation7 + $0x2d4] ss:$12 sps:$4 sm:$0xff]   ;;  %v1948_v33 = vld [vmem:[#allocation7 + $0x2d0] ss:$12 sps:$4 sm:$0xff]  }
 0x146   :  { %v383_v36 = vpack.c.bf16 %v379_v34, %v379_v34  ;;  %v385_v57 = vpack.c.bf16 %v381_v56, %v381_v56  ;;  %v1953_v34 = vld [vmem:[#allocation7 + $0x2ec] ss:$12 sps:$4 sm:$0xff]   ;;  %v1967_v49 = vld [vmem:[#allocation8 + $0x30] sm:$0xff]  }
 0x147   :  { %v1960_v42 = vld [vmem:[#allocation8 + $0x58] sm:$0xff]   ;;  %v1965_v47 = vld [vmem:[#allocation8 + $0x28] sm:$0xff]  }
 0x148   :  { %1075 = vmatprep.mubr.bf16.mxu0 %v383_v36  ;;  %1157 = vmatprep.mubr.bf16.mxu1 %v383_v36  ;;  %v1954_v36 = vld [vmem:[#allocation8 + $0x40] sm:$0xff]   ;;  %v1968_v50 = vld [vmem:[#allocation8 + $0x78] sm:$0xff]  }
 0x149   :  { %1076 = vmatmul.mubr.bf16.vlgmr.msra.gmra.mrb[4].mxu0 %v382_v39  ;;  %1158 = vmatmul.mubr.bf16.vlgmr.msra.gmra.mrb[4].mxu1 %v382_v39  ;;  %v1957_v39 = vld [vmem:[#allocation8 + $0x8] sm:$0xff]  }
 0x14a   :  { %1085 = vmatpush1.bf16.msra.mxu0 %v1890_v37  ;;  %1686 = vmatpush3.bf16.msra.mxu1 %v1894_v38  ;;  %v1955_v37 = vld [vmem:[#allocation8] sm:$0xff]   ;;  %v1956_v38 = vld [vmem:[#allocation8 + $0x48] sm:$0xff]  }
 0x14b   :  { %1086 = vmatprep.subr.bf16.mxu0 %v1897_v40  ;;  %1687 = vmatprep.subr.bf16.mxu1 %v1898_v41  ;;  %v1958_v40 = vld [vmem:[#allocation8 + $0x50] sm:$0xff]  }
 0x14c   :  { %1197 = vmatprep.mubr.bf16.mxu1 %v385_v57  ;;  %1116 = vmatprep.mubr.bf16.mxu0 %v385_v57  ;;  %v1959_v41 = vld [vmem:[#allocation8 + $0x10] sm:$0xff]  }
 0x14e   :  { %1087 = vmatpush1.bf16.msra.mxu0 %v1895_v43  ;;  %1688 = vmatpush3.bf16.msra.mxu1 %v1899_v44  ;;  %v1961_v43 = vld [vmem:[#allocation8 + $0x18] sm:$0xff]   ;;  %v1962_v44 = vld [vmem:[#allocation8 + $0x60] sm:$0xff]  }
 0x14f   :  { %1088 = vmatprep.subr.bf16.mxu0 %v1902_v45  ;;  %1689 = vmatprep.subr.bf16.mxu1 %v1903_v46  ;;  %v1963_v45 = vld [vmem:[#allocation8 + $0x20] sm:$0xff]   ;;  %v1964_v46 = vld [vmem:[#allocation8 + $0x68] sm:$0xff]  }
 0x152   :  { %1089 = vmatpush1.bf16.msra.mxu0 %v1900_v51  ;;  %1690 = vmatpush3.bf16.msra.mxu1 %v1904_v52  ;;  %v1969_v51 = vld [vmem:[#allocation8 + $0x38] sm:$0xff]   ;;  %v2109_v52 = vmov 0.0  }
 0x153   :  { %1090 = vmatprep.subr.bf16.mxu0 %v1907_v54  ;;  %1691 = vmatprep.subr.bf16.mxu1 %v1908_v55 }
 0x156   :  { %1091 = vmatpush1.bf16.msra.mxu0 %v1905_v58  ;;  %1692 = vmatpush3.bf16.msra.mxu1 %v1909_v59  ;;  %v514_v58 = vld [vmem:[%s2249_s4] sm:$0x7] }
 0x157   :  { %1092 = vmatprep.subr.bf16.mxu0 %v1912_v60  ;;  %1693 = vmatprep.subr.bf16.mxu1 %v1913_v61  ;;  %v527_v59 = vrot.slane %v514_v58, %v126_v62 }
 0x15a   :  { %1093 = vmatpush1.bf16.msra.mxu0 %v1910_v63  ;;  %1694 = vmatpush3.bf16.msra.mxu1 %v1914_v0 }
 0x15b   :  { %1094 = vmatprep.subr.bf16.mxu0 %v1917_v1  ;;  %1695 = vmatprep.subr.bf16.mxu1 %v1918_v2 }
 0x15e   :  { %1095 = vmatpush1.bf16.msra.mxu0 %v1915_v4  ;;  %1696 = vmatpush3.bf16.msra.mxu1 %v1919_v5  ;;  %v519_v4 = vrot.slane %v514_v58, %v118_v22  ;;  %v523_v5 = vrot.slane %v514_v58, %v122_v24  ;;  %v1973_v22 = vld [vmem:[#allocation8 + $0x98] sm:$0xff]   ;;  %v1974_v24 = vld [vmem:[#allocation8 + $0xa0] sm:$0xff]  }
 0x15f   :  { %1096 = vmatprep.subr.bf16.mxu0 %v1922_v6  ;;  %1697 = vmatprep.subr.bf16.mxu1 %v1923_v7 }
 0x162   :  { %1097 = vmatpush1.bf16.msra.mxu0 %v1920_v9  ;;  %1698 = vmatpush3.bf16.msra.mxu1 %v1924_v10 }
 0x163   :  { %1098 = vmatprep.subr.bf16.mxu0 %v1927_v11  ;;  %1699 = vmatprep.subr.bf16.mxu1 %v1928_v12 }
 0x166   :  { %1099 = vmatpush1.bf16.msra.mxu0 %v1925_v14  ;;  %1700 = vmatpush3.bf16.msra.mxu1 %v1929_v15  ;;  %v1970_v14 = vld [vmem:[#allocation8 + $0x80] sm:$0xff]  }
 0x167   :  { %1100 = vmatprep.subr.bf16.mxu0 %v1932_v16  ;;  %1707 = vmatprep.subr.bf16.mxu1 %v1954_v36  ;;  %v1971_v16 = vld [vmem:[#allocation8 + $0x88] sm:$0xff]  }
 0x169   :  { %1198 = vmatmul.mubr.bf16.vlgmr.msra.gmra.mrb[8].mxu1 %v384_v17 }
 0x16a   :  { %1101 = vmatpush1.bf16.msra.mxu0 %v1930_v18  ;;  %1708 = vmatpush3.bf16.msra.mxu1 %v1955_v37  ;;  %v1976_v18 = vld [vmem:[#allocation8 + $0xb0] sm:$0xff]  }
 0x16b   :  { %1102 = vmatprep.subr.bf16.mxu0 %v1935_v19  ;;  %1709 = vmatprep.subr.bf16.mxu1 %v1956_v38  ;;  %v1977_v19 = vld [vmem:[#allocation8 + $0xb8] sm:$0xff]  }
 0x16e   :  { %1103 = vmatpush1.bf16.msra.mxu0 %v1933_v20  ;;  %1710 = vmatpush3.bf16.msra.mxu1 %v1957_v39 }
 0x16f   :  { %1104 = vmatprep.subr.bf16.mxu0 %v1938_v23  ;;  %1711 = vmatprep.subr.bf16.mxu1 %v1958_v40 }
 0x172   :  { %1105 = vmatpush1.bf16.msra.mxu0 %v1936_v25  ;;  %1712 = vmatpush3.bf16.msra.mxu1 %v1959_v41 }
 0x173   :  { %1106 = vmatprep.subr.bf16.mxu0 %v1941_v26  ;;  %1713 = vmatprep.subr.bf16.mxu1 %v1960_v42 }
 0x176   :  { %1107 = vmatpush1.bf16.msra.mxu0 %v1939_v27  ;;  %1714 = vmatpush3.bf16.msra.mxu1 %v1961_v43 }
 0x177   :  { %1108 = vmatprep.subr.bf16.mxu0 %v1944_v28  ;;  %1715 = vmatprep.subr.bf16.mxu1 %v1962_v44 }
 0x17a   :  { %1109 = vmatpush1.bf16.msra.mxu0 %v1942_v29  ;;  %1716 = vmatpush3.bf16.msra.mxu1 %v1963_v45 }
 0x17b   :  { %1110 = vmatprep.subr.bf16.mxu0 %v1947_v30  ;;  %1717 = vmatprep.subr.bf16.mxu1 %v1964_v46  ;;  %v1638_v30 = vld [vmem:[%s2251_s6] ss:$0 sm:$0xff] }
 0x17e   :  { %1111 = vmatpush1.bf16.msra.mxu0 %v1945_v31  ;;  %1718 = vmatpush3.bf16.msra.mxu1 %v1965_v47 }
 0x17f   :  { %1112 = vmatprep.subr.bf16.mxu0 %v1950_v32  ;;  %1719 = vmatprep.subr.bf16.mxu1 %v1966_v48 }
 0x182   :  { %1113 = vmatpush1.bf16.msra.mxu0 %v1948_v33  ;;  %1720 = vmatpush3.bf16.msra.mxu1 %v1967_v49 }
 0x183   :  { %1114 = vmatprep.subr.bf16.mxu0 %v1953_v34  ;;  %1721 = vmatprep.subr.bf16.mxu1 %v1968_v50 }
 0x186   :  { %1115 = vmatpush1.bf16.msra.mxu0 %v1951_v35  ;;  %1722 = vmatpush3.bf16.msra.mxu1 %v1969_v51 }
 0x187   :  { %1738 = vmatprep.subr.bf16.mxu1 %v2109_v52 }
 0x189   :  { %1117 = vmatmul.mubr.bf16.vlgmr.msra.gmra.mrb[4].mxu0 %v384_v17  ;;  %v1975_v17 = vld [vmem:[#allocation8 + $0xa8] sm:$0xff]  }
 0x21c   :  { %v1679_v53 = vpop.f32.mrb[4].mxu1 }
 0x21d   :  { %v1680_v54 = vpop.f32.mrb[5].mxu1 }
 0x21e   :  { %v1681_v55 = vadd.f32 %v1680_v54, %v1679_v53  ;;  %v1682_v56 = vpop.f32.mrb[6].mxu1 }
 0x21f   :  { %v1683_v57 = vpop.f32.mrb[7].mxu1 }
 0x220   :  { %v1160_v63 = vadd.f32 %v1681_v55, %v527_v59 }
 0x23c   :  { %v1701_v60 = vpop.f32.mrb[8].mxu1 }
 0x23d   :  { %v1702_v61 = vpop.f32.mrb[9].mxu1 }
 0x23e   :  { %v1703_v0 = vadd.f32 %v1702_v61, %v1701_v60  ;;  %v1704_v1 = vpop.f32.mrb[10].mxu1 }
 0x23f   :  { %v1705_v2 = vpop.f32.mrb[11].mxu1 }
 0x240   :  { %v1200_v3 = vadd.f32 %v1703_v0, %v1160_v63 }
 0x242   :  { %v1207_v20 = vmax.f32 %v1200_v3, 0.0 }
 0x244   :  { %v1210_v23 = vpack.c.bf16 %v1207_v20, %v1207_v20 }
 0x25c   :  { %v1118_v6 = vpop.f32.mrb[4].mxu0 }
 0x25d   :  { %v1758_v7 = vadd.f32 %v1118_v6, %v519_v4  ;;  %v1120_v8 = vpop.f32.mrb[5].mxu0 }
 0x25e   :  { %v1759_v9 = vadd.f32 %v1120_v8, %v523_v5  ;;  %v1122_v10 = vpop.f32.mrb[6].mxu0 }
 0x25f   :  { %v1205_v11 = vmax.f32 %v1758_v7, 0.0  ;;  %v1123_v62 = vpop.f32.mrb[7].mxu0 }
 0x260   :  { %v1206_v12 = vmax.f32 %v1759_v9, 0.0 }
 0x261   :  { %v1208_v15 = vpack.c.bf16 %v1205_v11, %v1205_v11 }
 0x262   :  { %v1209_v13 = vpack.c.bf16 %v1206_v12, %v1206_v12 }
 0x264   :  { %1442 = vmatprep.mubr.bf16.mxu1 %v1209_v13 }
 0x265   :  { %1443 = vmatmul.mubr.bf16.vlgmr.msra.gmra.mrb[12].mxu1 %v1208_v15 }
 0x266   :  { %1739 = vmatpush3.bf16.msra.mxu1 %v1970_v14  ;;  %1754 = vmatprep.mubr.msk.bf16.mxu1 %vm2110_vm0, %v2109_v52 }
 0x267   :  { %1740 = vmatprep.subr.bf16.mxu1 %v2109_v52 }
 0x26a   :  { %1741 = vmatpush3.bf16.msra.mxu1 %v1971_v16 }
 0x26b   :  { %1742 = vmatprep.subr.bf16.mxu1 %v2109_v52 }
 0x26e   :  { %1743 = vmatpush3.bf16.msra.mxu1 %v1972_v21 }
 0x26f   :  { %1744 = vmatprep.subr.bf16.mxu1 %v2109_v52 }
 0x272   :  { %1745 = vmatpush3.bf16.msra.mxu1 %v1973_v22 }
 0x273   :  { %1746 = vmatprep.subr.bf16.mxu1 %v2109_v52 }
 0x276   :  { %1747 = vmatpush3.bf16.msra.mxu1 %v1974_v24 }
 0x277   :  { %1748 = vmatprep.subr.bf16.mxu1 %v2109_v52 }
 0x27a   :  { %1749 = vmatpush3.bf16.msra.mxu1 %v1975_v17 }
 0x27b   :  { %1750 = vmatprep.subr.bf16.mxu1 %v2109_v52 }
 0x27e   :  { %1751 = vmatpush3.bf16.msra.mxu1 %v1976_v18 }
 0x27f   :  { %1752 = vmatprep.subr.bf16.mxu1 %v2109_v52 }
 0x282   :  { %1753 = vmatpush3.bf16.msra.mxu1 %v1977_v19 }
 0x285   :  { %1755 = vmatmul.mubr.bf16.vlgmr.msra.gmra.mrb[16].mxu1 %v1210_v23 }
 0x338   :  { %v1723_v25 = vpop.f32.mrb[12].mxu1 }
 0x339   :  { %v1724_v26 = vpop.f32.mrb[13].mxu1 }
 0x33a   :  { %v1725_v27 = vadd.f32 %v1724_v26, %v1723_v25  ;;  %v1726_v28 = vpop.f32.mrb[14].mxu1 }
 0x33b   :  { %v1727_v29 = vpop.f32.mrb[15].mxu1 }
 0x33c   :  { %v1445_v31 = vadd.f32 %v1725_v27, %v1638_v30 }
 0x358   :  { %v1484_v32 = vpop.f32.mrb[16].mxu1 }
 0x359   :  { %v1485_v33 = vadd.f32 %v1484_v32, %v1445_v31  ;;  %v1756_v34 = vpop.f32.mrb[17].mxu1 }
 0x35a   :  { %v1487_v35 = vpop.f32.mrb[18].mxu1 }
 0x35b   :  { %1978 = vtanh.f32 %v1485_v33  ;;  %v1757_v36 = vpop.f32.mrb[19].mxu1 }
 0x365   :  { %v1979_v37 = vpop.eup %1978 }
 0x366   :  { %v1491_v38 = vmul.f32 2.0, %v1979_v37 }
 0x368   :  { %1492 = vst [vmem:[#allocation10] sm:$0xff] %v1491_v38 }
 0x369   :  { %2079 = shalt.err (!%p2076_p8)
}
 0x36a   :  { %s2080_s12 = scalar_lea.hbm %s2252_s7, 128 }
 0x36b   :  { %p2081_p9 = scmp.ne.s32.totalorder %s2252_s7, %s2080_s12  ;;  %p2084_p10 = scmp.lt.u32.totalorder %s2080_s12, %s2252_s7 }
 0x36d   :  { %p2086_p11 = pnand %p2084_p10, %p2081_p9 }
 0x36f   :  { %2089 = shalt.err (!%p2086_p11)
}
 0x370   :  { %1502 = dma.vmem_to_hbm [thread:$0]  %s1500_s9, 128, %s2252_s7, [#allocation4]  }
 0x371   :  { %2096 = dma.done.wait [#allocation4], 128  }
 0x372   :  { %2097 = vsyncadd [#allocation4], 4294967168 }
 0x373   :  { %1506 = vsyncpa [#allocation3], 1 }
 0x374   :  { %1507 = vsyncpa [#allocation6], 1 }
 0x375   :  { %1508 = vsyncpa [#allocation9], 1 }
 0x376   :  { %1509 = vsyncpa [#allocation4], 1 }

</bundles_post_ra>
